<compile_context>
chip_gen: v7x
topology: tpu7x:2x2x1
jax: 0.10.0
libtpu: 0.0.40
codegen_flags: <defaults>
</compile_context>

<pallas_src>
import functools

import jax
import jax.numpy as jnp
import numpy as np
from jax.experimental import pallas as pl
from jax.experimental.pallas import tpu as pltpu

_MIB = 1024 * 1024
_MIN_PALLAS_BYTES = 512 * 1024      # below this input size, XLA's fused reduce wins


def _sublanes(dtype) -> int:
    """Native sublane multiple for the dtype (8 for 4B, 16 for 2B, 32 for 1B)."""
    return {4: 8, 2: 16, 1: 32}.get(jnp.dtype(dtype).itemsize, 8)


def _vmem_budget_and_limit():
    """(resident-block budget, vmem_limit_bytes), tuned per TPU generation."""
    cap = 0
    try:
        info_fn = getattr(pltpu, "get_tpu_info", None)
        if info_fn is not None:
            cap = int(getattr(info_fn(), "vmem_capacity_bytes", 0) or 0)
    except Exception:  # pragma: no cover - conservative default below
        cap = 0
    if cap >= 96 * _MIB:            # v5e / v6e: 128 MiB physical VMEM
        return 16 * _MIB, 64 * _MIB
    return 8 * _MIB, 32 * _MIB      # v7x (64 MiB physical) or unknown


def _ts_sum_kernel(x_ref, o_ref, *, rate, inv_rate):
    """Single grid step per row tile: x_ref (rate, tr, L) -> o_ref (tr, L)."""
    acc = x_ref[0].astype(jnp.float32)
    for r in range(1, rate):        # rate is small & static -> fully unrolled
        acc = acc + x_ref[r].astype(jnp.float32)
    o_ref[...] = (acc * inv_rate).astype(o_ref.dtype)


def _ts_accum_kernel(x_ref, o_ref, acc_ref, *, inv_rate):
    """Large-rate fallback: grid (tiles, rate); x_ref (tr, L), rate dim squeezed."""
    r = pl.program_id(1)

    @pl.when(r == 0)
    def _():
        acc_ref[...] = jnp.zeros_like(acc_ref)

    acc_ref[...] += x_ref[...].astype(jnp.float32)

    @pl.when(r == pl.num_programs(1) - 1)
    def _():
        o_ref[...] = (acc_ref[...] * inv_rate).astype(o_ref.dtype)


def _row_tile(rows, rate, itemsize, sub, lanes, budget, single_step):
    """Sublane-aligned row tile: as large as the VMEM budget allows, but split
    so the 'parallel' row axis has >= 2 grid steps whenever rows permits
    (keeps both v7x TensorCores busy; one extra cheap grid step elsewhere)."""
    if single_step:
        per_row = lanes * (2 * rate + 2) * itemsize          # 2x in + 2x out blocks
    else:
        per_row = lanes * (4 * itemsize + 4)                 # 2x in + 2x out + f32 acc
    tr = max(sub, (budget // per_row) // sub * sub)
    if rows > tr:
        return tr                                            # >= 2 tiles automatically
    if rows >= 2 * sub:
        return max(sub, (rows // 2) // sub * sub)            # force >= 2 tiles
    return rows                                              # one full-extent block


def ts_forward(x, rate: int, *, force_accumulate: bool = False,
               force_pallas: bool = False):
    """Pallas implementation of TS(rate): x.reshape(rate, B, *rest).mean(0)."""
    n = x.shape[0]
    assert n % rate == 0, "leading dim must be divisible by rate"
    b = n // rate
    rest = x.shape[1:]
    f = int(np.prod(rest)) if rest else 1
    m = b * f                                   # number of output elements

    if rate == 1:
        return x.reshape((b,) + rest)

    def _jnp_fallback():
        xr = x.reshape((rate, b) + rest).astype(jnp.float32)
        return jnp.mean(xr, axis=0).astype(x.dtype)

    itemsize = jnp.dtype(x.dtype).itemsize

    # Tiny inputs: pallas_call launch + wrapper overhead dominates; XLA's fused
    # reduce is already at the HBM roofline.
    if not force_pallas and rate * m * itemsize < _MIN_PALLAS_BYTES:
        return _jnp_fallback()

    # Pick the widest lane count that divides m exactly: the reshape below is then
    # a pure metadata op (no pad / no extra HBM pass) and every store is lane-dense.
    lanes = next((l for l in (512, 256, 128) if m % l == 0), None)
    if lanes is None:
        # TODO(synk): ragged tail (numel % 128 != 0); a strided slice + concat would
        # cost more HBM traffic than XLA's fused reduce, so fall back to jnp here.
        return _jnp_fallback()

    rows = m // lanes
    sub = _sublanes(x.dtype)
    budget, vmem_limit = _vmem_budget_and_limit()

    # Use the single-step (rate folded into one grid step) kernel whenever its
    # budgeted row tile stays reasonably fat; otherwise accumulate over a rate axis.
    tr_single = max(sub, (budget // (lanes * (2 * rate + 2) * itemsize)) // sub * sub)
    single_step = (not force_accumulate) and tr_single >= 64
    tr = _row_tile(rows, rate, itemsize, sub, lanes, budget, single_step)
    num_tiles = pl.cdiv(rows, tr)   # last tile may be ragged: Pallas masks it

    x3 = x.reshape(rate, rows, lanes)           # metadata-only reshape, no copy
    inv_rate = np.float32(1.0 / rate)
    cost = pl.CostEstimate(flops=rate * m, transcendentals=0,
                           bytes_accessed=(rate + 1) * m * itemsize)

    if single_step:
        out2 = pl.pallas_call(
            functools.partial(_ts_sum_kernel, rate=rate, inv_rate=inv_rate),
            out_shape=jax.ShapeDtypeStruct((rows, lanes), x.dtype),
            grid=(num_tiles,),
            in_specs=[pl.BlockSpec((rate, tr, lanes), lambda i: (0, i, 0))],
            out_specs=pl.BlockSpec((tr, lanes), lambda i: (i, 0)),
            compiler_params=pltpu.CompilerParams(
                dimension_semantics=("parallel",),
                vmem_limit_bytes=vmem_limit),
            cost_estimate=cost,
        )(x3)
    else:
        out2 = pl.pallas_call(
            functools.partial(_ts_accum_kernel, inv_rate=inv_rate),
            out_shape=jax.ShapeDtypeStruct((rows, lanes), x.dtype),
            grid=(num_tiles, rate),             # reduction axis last
            in_specs=[pl.BlockSpec((pl.Squeezed(), tr, lanes),
                                   lambda i, r: (r, i, 0))],
            out_specs=pl.BlockSpec((tr, lanes), lambda i, r: (i, 0)),
            scratch_shapes=[pltpu.VMEM((tr, lanes), jnp.float32)],
            compiler_params=pltpu.CompilerParams(
                dimension_semantics=("parallel", "arbitrary"),
                vmem_limit_bytes=vmem_limit),
            cost_estimate=cost,
        )(x3)

    return out2.reshape((b,) + rest)


if __name__ == "__main__":
    rate = 4
    base_key = jax.random.PRNGKey(0)

    def ref_ts(x, rate):
        # Pure-JAX mirror of the torch module (rate-major reshape, mean over axis 0).
        xr = x.reshape((rate, x.shape[0] // rate) + x.shape[1:]).astype(jnp.float32)
        return jnp.mean(xr, axis=0).astype(x.dtype)

    cases = [
        # (shape, dtype, kwargs, atol)
        ((rate * 2, 4, 16, 16), jnp.float32, {}, 1e-6),                       # tiny -> jnp short-circuit
        ((rate * 2, 4, 16, 16), jnp.float32, dict(force_pallas=True), 1e-6),  # single-step, one full block
        ((rate * 2, 4, 16, 16), jnp.float32,
         dict(force_pallas=True, force_accumulate=True), 1e-6),               # accumulator-grid path
        ((rate * 4, 32, 32, 32), jnp.float32, {}, 1e-6),                      # natural Pallas path, 2 tiles
        ((rate * 2, 8, 32, 32), jnp.bfloat16, dict(force_pallas=True), 3e-2), # bf16 (16-sublane) path
        ((rate * 5, 16, 16, 16), jnp.float32, dict(force_pallas=True), 1e-6), # ragged (masked) last row tile
        ((rate * 2, 3, 5, 7), jnp.float32, dict(force_pallas=True), 1e-6),    # numel % 128 != 0 -> jnp fallback
    ]

    for idx, (shape, dtype, kwargs, atol) in enumerate(cases):
        key = jax.random.fold_in(base_key, idx)
        x = jax.random.normal(key, shape, dtype=jnp.float32).astype(dtype)
        out = jax.block_until_ready(ts_forward(x, rate, **kwargs))
        ref = jax.block_until_ready(ref_ts(x, rate))
        np.testing.assert_allclose(
            np.asarray(out, dtype=np.float32), np.asarray(ref, dtype=np.float32),
            rtol=0.0, atol=atol,
            err_msg=f"case {idx}: shape={shape} dtype={np.dtype(dtype)} kwargs={kwargs}")

    print("KERNEL_OK")
</pallas_src>

<mosaic_0001>
module attributes {stable_mosaic.version = 11 : i64} {
  func.func @_ts_sum_kernel(%arg0: i32, %arg1: memref<4x4x512xf32, #tpu.memory_space<vmem>>, %arg2: memref<4x512xf32, #tpu.memory_space<vmem>>) attributes {dimension_semantics = [#tpu.dimension_semantics<parallel>], iteration_bounds = array<i64: 1>, scalar_prefetch = 0 : i64, scratch_operands = 0 : i64, tpu.core_type = #tpu.core_type<tc>, window_params = [{transform_indices = @transform_0, window_bounds = array<i64: 4, 4, 512>}, {transform_indices = @transform_1, window_bounds = array<i64: 4, 512>}]} {
    %c0 = arith.constant 0 : index
    %c0_0 = arith.constant 0 : index
    %c0_1 = arith.constant 0 : index
    %0 = vector.load %arg1[%c0, %c0_0, %c0_1] : memref<4x4x512xf32, #tpu.memory_space<vmem>>, vector<1x4x512xf32>
    %1 = vector.shape_cast %0 : vector<1x4x512xf32> to vector<4x512xf32>
    %c1 = arith.constant 1 : index
    %c0_2 = arith.constant 0 : index
    %c0_3 = arith.constant 0 : index
    %2 = vector.load %arg1[%c1, %c0_2, %c0_3] : memref<4x4x512xf32, #tpu.memory_space<vmem>>, vector<1x4x512xf32>
    %3 = vector.shape_cast %2 : vector<1x4x512xf32> to vector<4x512xf32>
    %4 = arith.addf %1, %3 : vector<4x512xf32>
    %c2 = arith.constant 2 : index
    %c0_4 = arith.constant 0 : index
    %c0_5 = arith.constant 0 : index
    %5 = vector.load %arg1[%c2, %c0_4, %c0_5] : memref<4x4x512xf32, #tpu.memory_space<vmem>>, vector<1x4x512xf32>
    %6 = vector.shape_cast %5 : vector<1x4x512xf32> to vector<4x512xf32>
    %7 = arith.addf %4, %6 : vector<4x512xf32>
    %c3 = arith.constant 3 : index
    %c0_6 = arith.constant 0 : index
    %c0_7 = arith.constant 0 : index
    %8 = vector.load %arg1[%c3, %c0_6, %c0_7] : memref<4x4x512xf32, #tpu.memory_space<vmem>>, vector<1x4x512xf32>
    %9 = vector.shape_cast %8 : vector<1x4x512xf32> to vector<4x512xf32>
    %10 = arith.addf %7, %9 : vector<4x512xf32>
    %cst = arith.constant 2.500000e-01 : f32
    %11 = vector.broadcast %cst : f32 to vector<4x512xf32>
    %12 = arith.mulf %10, %11 : vector<4x512xf32>
    %c0_8 = arith.constant 0 : index
    %c0_9 = arith.constant 0 : index
    %13 = vector.load %arg2[%c0_8, %c0_9] : memref<4x512xf32, #tpu.memory_space<vmem>>, vector<4x512xf32>
    tpu.vector_store %arg2[%c0_8, %c0_9], %12 {strides = array<i32>} : memref<4x512xf32, #tpu.memory_space<vmem>>, vector<4x512xf32>,
    return
  }
  func.func @transform_0(%arg0: i32) -> (i32, i32, i32) {
    %c0_i32 = arith.constant 0 : i32
    %c0_i32_0 = arith.constant 0 : i32
    %c0_i32_1 = arith.constant 0 : i32
    return %c0_i32, %arg0, %c0_i32_0 : i32, i32, i32
  }
  func.func @transform_1(%arg0: i32) -> (i32, i32) {
    %c0_i32 = arith.constant 0 : i32
    %c0_i32_0 = arith.constant 0 : i32
    return %arg0, %c0_i32 : i32, i32
  }
}

</mosaic_0001>

<bundles_post_ra>
// kernel: tpu_custom_call.1
= control target key start
LH: loop header
LB: loop body
LE: loop exit
PB: predicated region body
PF: predicated region fallthrough
CT: control target
= control target key end

     0   :  { %6 = vsyncpa [#allocation3], 0  ;;  %s149_s0 = inlined_call_operand.hbm [shape: f32[4,4,512], index: 0, kind: input, shape index: {}]   ;;  %s150_s1 = inlined_call_operand.hbm [shape: f32[4,512], index: 1, kind: output, shape index: {}]  }
   0x1   :  { %7 = vsyncpa [#allocation4], 0  ;;  %s111_s6 = smov [#allocation2]   ;;  %s63_s10 = scalar_lea.hbm %s149_s0, 1024 }
   0x2   :  { %s13_s7 = sshll.u32 %s111_s6, 4  ;;  %p64_p0 = scmp.ne.s32.totalorder %s149_s0, %s63_s10  ;;  %s14_s7 = int_to_ptr.vmem [resolvable:$true] %s13_s7 }
   0x3   :  { %p67_p1 = scmp.lt.u32.totalorder %s63_s10, %s149_s0 }
   0x5   :  { %p69_p2 = pnand %p67_p1, %p64_p0 }
   0x7   :  { %72 = shalt.err (!%p69_p2)
}
   0x8   :  { %s73_s15 = scalar_lea.vmem %s14_s7, 1024  ;;  %p78_p4 = scmp.lt.s32.totalorder %s14_s7, %s14_s7 }
   0x9   :  { %p74_p3 = scmp.ne.s32.totalorder %s14_s7, %s73_s15  ;;  %p79_p5 = scmp.lt.s32.totalorder %s73_s15, %s73_s15 }
   0xb   :  { %p80_p6 = por %p79_p5, %p78_p4 }
   0xd   :  { %p81_p7 = pnand %p80_p6, %p74_p3 }
   0xf   :  { %84 = shalt.err (!%p81_p7)
}
  0x10   :  { %s112_s16 = smov 256   ;;  %s113_s17 = smov 16  }
  0x11   :  { %19 = dma.hbm_to_vmem [thread:$0]  %s149_s0, 1024, %s14_s7, [#allocation3], %s112_s16, %s112_s16, %s113_s17  }
  0x12   :  { %107 = dma.done.wait [#allocation3], 1024  }
  0x13   :  { %108 = vsyncadd [#allocation3], 4294966272  ;;  %v23_v0 = vld [vmem:[#allocation2] sm:$0xff]  ;;  %v26_v1 = vld [vmem:[#allocation2 + $0x10] sm:$0xff]  ;;  %s114_s20 = smov [#allocation5]  }
  0x14   :  { %v31_v2 = vld [vmem:[#allocation2 + $0x20] sm:$0xff]  ;;  %v28_v3 = vadd.f32 %v26_v1, %v23_v0  ;;  %v24_v4 = vld [vmem:[#allocation2 + $0x8] sm:$0xff]  ;;  %v27_v5 = vld [vmem:[#allocation2 + $0x18] sm:$0xff]  ;;  %s50_s21 = sshll.u32 %s114_s20, 4  ;;  %s51_s21 = int_to_ptr.vmem [resolvable:$true] %s50_s21 }
  0x15   :  { %v36_v6 = vld [vmem:[#allocation2 + $0x30] sm:$0xff]  ;;  %v29_v7 = vadd.f32 %v27_v5, %v24_v4  ;;  %v32_v8 = vld [vmem:[#allocation2 + $0x28] sm:$0xff]  ;;  %v37_v10 = vld [vmem:[#allocation2 + $0x38] sm:$0xff]  ;;  %s85_s0 = scalar_lea.vmem %s51_s21, 256  ;;  %p90_p9 = scmp.lt.s32.totalorder %s51_s21, %s51_s21 }
  0x16   :  { %v33_v9 = vadd.f32 %v31_v2, %v28_v3  ;;  %p86_p8 = scmp.ne.s32.totalorder %s51_s21, %s85_s0  ;;  %p91_p10 = scmp.lt.s32.totalorder %s85_s0, %s85_s0 }
  0x17   :  { %v34_v11 = vadd.f32 %v32_v8, %v29_v7 }
  0x18   :  { %v38_v12 = vadd.f32 %v36_v6, %v33_v9  ;;  %p92_p11 = por %p91_p10, %p90_p9 }
  0x19   :  { %v39_v13 = vadd.f32 %v37_v10, %v34_v11 }
  0x1a   :  { %v40_v14 = vmul.f32 0.25, %v38_v12  ;;  %p93_p12 = pnand %p92_p11, %p86_p8 }
  0x1b   :  { %v41_v15 = vmul.f32 0.25, %v39_v13 }
  0x1c   :  { %42 = vst [vmem:[#allocation5] sm:$0xff] %v40_v14 }
  0x1d   :  { %43 = vst [vmem:[#allocation5 + $0x8] sm:$0xff] %v41_v15 }
  0x1e   :  { %96 = shalt.err (!%p93_p12)
}
  0x1f   :  { %s97_s24 = scalar_lea.hbm %s150_s1, 256 }
  0x20   :  { %p98_p13 = scmp.ne.s32.totalorder %s150_s1, %s97_s24  ;;  %p101_p0 = scmp.lt.u32.totalorder %s97_s24, %s150_s1 }
  0x22   :  { %p103_p1 = pnand %p101_p0, %p98_p13 }
  0x24   :  { %106 = shalt.err (!%p103_p1)
}
  0x25   :  { %53 = dma.vmem_to_hbm [thread:$0]  %s51_s21, 256, %s150_s1, [#allocation4]  }
  0x26   :  { %109 = dma.done.wait [#allocation4], 256  }
  0x27   :  { %110 = vsyncadd [#allocation4], 4294967040 }
  0x28   :  { %57 = vsyncpa [#allocation3], 1 }
  0x29   :  { %58 = vsyncpa [#allocation4], 1 }

</bundles_post_ra>
